<compile_context>
chip_gen: v6e
topology: v6e:2x2x1
jax: 0.10.0
libtpu: 0.0.40
codegen_flags: <defaults>
</compile_context>

<pallas_src>
import jax
import jax.numpy as jnp
from jax.experimental import pallas as pl
from jax.experimental.pallas import tpu as pltpu


def _tta_model_kernel(x_ref, w_ref, b_ref, o_ref):
    # x_ref: (B*T, K) bf16   all augmented images, flattened, B-major rows
    # w_ref: (K, N)   bf16   classifier weight (pre-cast once at init)
    # b_ref: (1, N)   f32    bias
    # o_ref: (B*T, N) f32    logits, lane/sublane-dense output tile
    logits = jnp.dot(x_ref[...], w_ref[...],
                     preferred_element_type=jnp.float32)      # bf16 MXU, f32 acc
    o_ref[...] = logits + b_ref[...]                          # f32 epilogue (v5e-safe)


def tta_forward(image, w_bf16, bias):
    """Pallas implementation of WrapperTTA.forward.

    image : (B, C, H, W) float32   (NCHW, like PyTorch)
    w_bf16: (C*H*W, N)    bfloat16  synthetic linear-classifier weight (pre-cast)
    bias  : (1, N)        float32
    returns (B, T, N) float32, T = number of TTA transforms (= 4)
    """
    B, C, H, W = image.shape
    K = C * H * W
    N = w_bf16.shape[1]

    # --- TTA transforms (augmentation glue, plain JAX) -----------------
    # Cast to bf16 first (review): the 4x-replicated intermediate is built
    # and stored directly in bf16, no trailing convert op.
    img = image.astype(jnp.bfloat16)
    augs = [
        img,                       # identity
        img[:, :, :, ::-1],        # horizontal flip
        img[:, :, ::-1, :],        # vertical flip
        img[:, :, ::-1, ::-1],     # both flips
    ]
    T = len(augs)
    # B-major row order (row = b*T + t): output reshapes directly to (B, T, N),
    # matching torch.stack(augmented_logits, dim=1) with no transpose.
    aug = jnp.stack(augs, axis=1).reshape(B * T, K)

    M = B * T
    cost = pl.CostEstimate(
        flops=2 * M * K * N,
        transcendentals=0,
        bytes_accessed=M * K * 2 + K * N * 2 + N * 4 + M * N * 4,
    )
    vmem = pl.BlockSpec(memory_space=pltpu.MemorySpace.VMEM)

    # Single kernel invocation, no grid: whole (B*T, K) / (K, N) / (1, N)
    # operands live in VMEM once (no double-buffered weight copies).
    out_btn = pl.pallas_call(
        _tta_model_kernel,
        out_shape=jax.ShapeDtypeStruct((M, N), jnp.float32),
        in_specs=[vmem, vmem, vmem],
        out_specs=vmem,
        cost_estimate=cost,
    )(aug, w_bf16, bias)

    return out_btn.reshape(B, T, N)


if __name__ == "__main__":
    # TODO(synk): the wrapped `model` in WrapperTTA is arbitrary; a linear
    # classifier stands in for it here (deterministic in-script init).
    B, C, H, W = 2, 4, 16, 16
    N_CLASSES = 128
    K = C * H * W

    key = jax.random.PRNGKey(0)
    k_img, k_w, k_b = jax.random.split(key, 3)
    image = jax.random.normal(k_img, (B, C, H, W), dtype=jnp.float32)
    weight = (jax.random.normal(k_w, (K, N_CLASSES), dtype=jnp.float32)
              * (1.0 / jnp.sqrt(K)))
    bias = jax.random.normal(k_b, (1, N_CLASSES), dtype=jnp.float32) * 0.01

    # One-time weight cast at "model init" (review: hoisted out of the
    # per-call jitted path).
    w_bf16 = jax.device_put(weight.astype(jnp.bfloat16))

    fwd = jax.jit(tta_forward)
    out = fwd(image, w_bf16, bias)
    out = jax.block_until_ready(out)

    # reference check (pure JAX, f32) of the same TTA + linear model;
    # tolerance loosened because the kernel feeds bf16 to the MXU.
    def ref(image):
        augs = [image, image[:, :, :, ::-1], image[:, :, ::-1, :],
                image[:, :, ::-1, ::-1]]
        logits = [a.reshape(B, K) @ weight + bias for a in augs]
        return jnp.stack(logits, 1)

    expected = ref(image)
    assert out.shape == (B, 4, N_CLASSES)
    assert jnp.allclose(out, expected, atol=5e-2, rtol=5e-2)
    print("KERNEL_OK")
</pallas_src>

<mosaic_0001>
module attributes {stable_mosaic.version = 11 : i64} {
  func.func @_tta_model_kernel(%arg0: memref<8x1024xbf16, #tpu.memory_space<vmem>>, %arg1: memref<1024x128xbf16, #tpu.memory_space<vmem>>, %arg2: memref<1x128xf32, #tpu.memory_space<vmem>>, %arg3: memref<8x128xf32, #tpu.memory_space<vmem>>) attributes {dimension_semantics = [], scalar_prefetch = 0 : i64, scratch_operands = 0 : i64, tpu.core_type = #tpu.core_type<tc>} {
    %c0 = arith.constant 0 : index
    %c0_0 = arith.constant 0 : index
    %0 = vector.load %arg0[%c0, %c0_0] : memref<8x1024xbf16, #tpu.memory_space<vmem>>, vector<8x1024xbf16>
    %c0_1 = arith.constant 0 : index
    %c0_2 = arith.constant 0 : index
    %1 = vector.load %arg1[%c0_1, %c0_2] : memref<1024x128xbf16, #tpu.memory_space<vmem>>, vector<1024x128xbf16>
    %cst = arith.constant dense<0.000000e+00> : vector<8x128xf32>
    %2 = tpu.matmul %0, %1, %cst {dimension_numbers = #tpu.dot_dimension_numbers<[1], [0], [0], [1], [0, 0, 1, 1], [], []>} : vector<8x1024xbf16>, vector<1024x128xbf16>, vector<8x128xf32> -> vector<8x128xf32>
    %c0_3 = arith.constant 0 : index
    %c0_4 = arith.constant 0 : index
    %3 = vector.load %arg2[%c0_3, %c0_4] : memref<1x128xf32, #tpu.memory_space<vmem>>, vector<1x128xf32>
    %4 = vector.broadcast %3 : vector<1x128xf32> to vector<8x128xf32>
    %5 = arith.addf %2, %4 : vector<8x128xf32>
    %c0_5 = arith.constant 0 : index
    %c0_6 = arith.constant 0 : index
    %6 = vector.load %arg3[%c0_5, %c0_6] : memref<8x128xf32, #tpu.memory_space<vmem>>, vector<8x128xf32>
    tpu.vector_store %arg3[%c0_5, %c0_6], %5 {strides = array<i32>} : memref<8x128xf32, #tpu.memory_space<vmem>>, vector<8x128xf32>,
    return
  }
}

</mosaic_0001>

<bundles_post_ra>
// kernel: tta_forward.1
= control target key start
LH: loop header
LB: loop body
LE: loop exit
PB: predicated region body
PF: predicated region fallthrough
CT: control target
= control target key end

     0   :  { %s1229_s0 = inlined_call_operand.vmem [shape: bf16[8,1024], index: 0, kind: input, shape index: {}]   ;;  %s1230_s1 = inlined_call_operand.vmem [shape: bf16[1024,128], index: 1, kind: input, shape index: {}]   ;;  %s1231_s2 = inlined_call_operand.vmem [shape: f32[1,128], index: 2, kind: input, shape index: {}]   ;;  %s1232_s3 = inlined_call_operand.hbm [shape: f32[8,128], index: 3, kind: output, shape index: {}]  }
   0x1   :  { %v904_v0 = vld [vmem:[%s1230_s1 + $0x78] sm:$0xff]   ;;  %v908_v4 = vld [vmem:[%s1230_s1 + $0x70] sm:$0xff]   ;;  %v912_v8 = vld [vmem:[%s1230_s1 + $0x68] sm:$0xff]  }
   0x2   :  { %v905_v1 = vld [vmem:[%s1230_s1 + $0xf8] sm:$0xff]   ;;  %815 = vmatprep.subr.bf16.mxu0 %v904_v0  ;;  %v909_v5 = vld [vmem:[%s1230_s1 + $0xf0] sm:$0xff]   ;;  %v913_v9 = vld [vmem:[%s1230_s1 + $0xe8] sm:$0xff]  }
   0x3   :  { %v906_v2 = vld [vmem:[%s1230_s1 + $0x38] sm:$0xff]   ;;  %837 = vmatprep.subr.bf16.mxu1 %v905_v1  ;;  %v910_v6 = vld [vmem:[%s1230_s1 + $0x30] sm:$0xff]   ;;  %v914_v10 = vld [vmem:[%s1230_s1 + $0x28] sm:$0xff]  }
   0x4   :  { %v907_v3 = vld [vmem:[%s1230_s1 + $0xb8] sm:$0xff]   ;;  %816 = vmatpush3.bf16.msra.mxu0 %v906_v2  ;;  %v911_v7 = vld [vmem:[%s1230_s1 + $0xb0] sm:$0xff]   ;;  %v915_v11 = vld [vmem:[%s1230_s1 + $0xa8] sm:$0xff]  }
   0x5   :  { %838 = vmatpush3.bf16.msra.mxu1 %v907_v3  ;;  %817 = vmatprep.subr.bf16.mxu0 %v908_v4  ;;  %v916_v12 = vld [vmem:[%s1230_s1 + $0x60] sm:$0xff]   ;;  %v920_v16 = vld [vmem:[%s1230_s1 + $0x58] sm:$0xff]   ;;  %v924_v20 = vld [vmem:[%s1230_s1 + $0x50] sm:$0xff]  }
   0x6   :  { %839 = vmatprep.subr.bf16.mxu1 %v909_v5  ;;  %v917_v13 = vld [vmem:[%s1230_s1 + $0xe0] sm:$0xff]   ;;  %v921_v17 = vld [vmem:[%s1230_s1 + $0xd8] sm:$0xff]   ;;  %v925_v21 = vld [vmem:[%s1230_s1 + $0xd0] sm:$0xff]  }
   0x7   :  { %v918_v14 = vld [vmem:[%s1230_s1 + $0x20] sm:$0xff]   ;;  %v922_v18 = vld [vmem:[%s1230_s1 + $0x18] sm:$0xff]   ;;  %v926_v22 = vld [vmem:[%s1230_s1 + $0x10] sm:$0xff]  }
   0x8   :  { %818 = vmatpush3.bf16.msra.mxu0 %v910_v6  ;;  %v919_v15 = vld [vmem:[%s1230_s1 + $0xa0] sm:$0xff]   ;;  %v923_v19 = vld [vmem:[%s1230_s1 + $0x98] sm:$0xff]   ;;  %v927_v23 = vld [vmem:[%s1230_s1 + $0x90] sm:$0xff]  }
   0x9   :  { %840 = vmatpush3.bf16.msra.mxu1 %v911_v7  ;;  %819 = vmatprep.subr.bf16.mxu0 %v912_v8  ;;  %v928_v24 = vld [vmem:[%s1230_s1 + $0x48] sm:$0xff]   ;;  %v932_v28 = vld [vmem:[%s1230_s1 + $0x40] sm:$0xff]   ;;  %v940_v38 = vld [vmem:[%s1230_s1 + $0x178] sm:$0xff]  }
   0xa   :  { %841 = vmatprep.subr.bf16.mxu1 %v913_v9  ;;  %v929_v25 = vld [vmem:[%s1230_s1 + $0xc8] sm:$0xff]   ;;  %v933_v29 = vld [vmem:[%s1230_s1 + $0xc0] sm:$0xff]   ;;  %v941_v39 = vld [vmem:[%s1230_s1 + $0x1f8] sm:$0xff]  }
   0xb   :  { %v930_v26 = vld [vmem:[%s1230_s1 + $0x8] sm:$0xff]   ;;  %v934_v30 = vld [vmem:[%s1230_s1] sm:$0xff]   ;;  %v942_v40 = vld [vmem:[%s1230_s1 + $0x138] sm:$0xff]  }
   0xc   :  { %820 = vmatpush3.bf16.msra.mxu0 %v914_v10  ;;  %v931_v27 = vld [vmem:[%s1230_s1 + $0x88] sm:$0xff]   ;;  %v935_v31 = vld [vmem:[%s1230_s1 + $0x80] sm:$0xff]   ;;  %v943_v41 = vld [vmem:[%s1230_s1 + $0x1b8] sm:$0xff]  }
   0xd   :  { %842 = vmatpush3.bf16.msra.mxu1 %v915_v11  ;;  %821 = vmatprep.subr.bf16.mxu0 %v916_v12  ;;  %v16_v32 = vld [vmem:[%s1229_s0] sm:$0xff]  ;;  %v17_v33 = vld [vmem:[%s1229_s0 + $0x8] sm:$0xff]  ;;  %v944_v42 = vld [vmem:[%s1230_s1 + $0x170] sm:$0xff]  }
   0xe   :  { %843 = vmatprep.subr.bf16.mxu1 %v917_v13  ;;  %v743_v34 = vcombine.low %v16_v32, %v16_v32  ;;  %v744_v35 = vcombine.high %v16_v32, %v16_v32  ;;  %v745_v36 = vcombine.low %v17_v33, %v17_v33  ;;  %v746_v37 = vcombine.high %v17_v33, %v17_v33  ;;  %v945_v43 = vld [vmem:[%s1230_s1 + $0x1f0] sm:$0xff]   ;;  %v948_v46 = vld [vmem:[%s1230_s1 + $0x168] sm:$0xff]   ;;  %v952_v50 = vld [vmem:[%s1230_s1 + $0x160] sm:$0xff]  }
   0xf   :  { %v946_v44 = vld [vmem:[%s1230_s1 + $0x130] sm:$0xff]   ;;  %v949_v47 = vld [vmem:[%s1230_s1 + $0x1e8] sm:$0xff]   ;;  %v953_v51 = vld [vmem:[%s1230_s1 + $0x1e0] sm:$0xff]  }
  0x10   :  { %822 = vmatpush3.bf16.msra.mxu0 %v918_v14  ;;  %599 = vmatprep.mubr.bf16.mxu0 %v744_v35  ;;  %v947_v45 = vld [vmem:[%s1230_s1 + $0x1b0] sm:$0xff]   ;;  %v950_v48 = vld [vmem:[%s1230_s1 + $0x128] sm:$0xff]   ;;  %v954_v52 = vld [vmem:[%s1230_s1 + $0x120] sm:$0xff]  }
  0x11   :  { %844 = vmatpush3.bf16.msra.mxu1 %v919_v15  ;;  %823 = vmatprep.subr.bf16.mxu0 %v920_v16  ;;  %v951_v49 = vld [vmem:[%s1230_s1 + $0x1a8] sm:$0xff]   ;;  %v955_v53 = vld [vmem:[%s1230_s1 + $0x1a0] sm:$0xff]   ;;  %v956_v54 = vld [vmem:[%s1230_s1 + $0x158] sm:$0xff]  }
  0x12   :  { %845 = vmatprep.subr.bf16.mxu1 %v921_v17  ;;  %639 = vmatprep.mubr.bf16.mxu1 %v746_v37  ;;  %v957_v55 = vld [vmem:[%s1230_s1 + $0x1d8] sm:$0xff]   ;;  %v960_v58 = vld [vmem:[%s1230_s1 + $0x150] sm:$0xff]   ;;  %v964_v62 = vld [vmem:[%s1230_s1 + $0x148] sm:$0xff]  }
  0x13   :  { %v958_v56 = vld [vmem:[%s1230_s1 + $0x118] sm:$0xff]   ;;  %v961_v59 = vld [vmem:[%s1230_s1 + $0x1d0] sm:$0xff]   ;;  %v965_v63 = vld [vmem:[%s1230_s1 + $0x1c8] sm:$0xff]  }
  0x14   :  { %824 = vmatpush3.bf16.msra.mxu0 %v922_v18  ;;  %v959_v57 = vld [vmem:[%s1230_s1 + $0x198] sm:$0xff]   ;;  %v962_v60 = vld [vmem:[%s1230_s1 + $0x110] sm:$0xff]   ;;  %v966_v0 = vld [vmem:[%s1230_s1 + $0x108] sm:$0xff]  }
  0x15   :  { %846 = vmatpush3.bf16.msra.mxu1 %v923_v19  ;;  %825 = vmatprep.subr.bf16.mxu0 %v924_v20  ;;  %v963_v61 = vld [vmem:[%s1230_s1 + $0x190] sm:$0xff]   ;;  %v967_v1 = vld [vmem:[%s1230_s1 + $0x188] sm:$0xff]   ;;  %v968_v2 = vld [vmem:[%s1230_s1 + $0x140] sm:$0xff]  }
  0x16   :  { %847 = vmatprep.subr.bf16.mxu1 %v925_v21  ;;  %v969_v3 = vld [vmem:[%s1230_s1 + $0x1c0] sm:$0xff]   ;;  %v18_v6 = vld [vmem:[%s1229_s0 + $0x10] sm:$0xff]  ;;  %v19_v9 = vld [vmem:[%s1229_s0 + $0x18] sm:$0xff] }
  0x17   :  { %v970_v4 = vld [vmem:[%s1230_s1 + $0x100] sm:$0xff]   ;;  %v747_v7 = vcombine.low %v18_v6, %v18_v6  ;;  %v748_v8 = vcombine.high %v18_v6, %v18_v6 }
  0x18   :  { %826 = vmatpush3.bf16.msra.mxu0 %v926_v22  ;;  %v971_v5 = vld [vmem:[%s1230_s1 + $0x180] sm:$0xff]  }
  0x19   :  { %848 = vmatpush3.bf16.msra.mxu1 %v927_v23  ;;  %827 = vmatprep.subr.bf16.mxu0 %v928_v24 }
  0x1a   :  { %849 = vmatprep.subr.bf16.mxu1 %v929_v25 }
  0x1c   :  { %828 = vmatpush3.bf16.msra.mxu0 %v930_v26 }
  0x1d   :  { %850 = vmatpush3.bf16.msra.mxu1 %v931_v27  ;;  %829 = vmatprep.subr.bf16.mxu0 %v932_v28 }
  0x1e   :  { %851 = vmatprep.subr.bf16.mxu1 %v933_v29 }
  0x20   :  { %830 = vmatpush3.bf16.msra.mxu0 %v934_v30 }
  0x21   :  { %852 = vmatpush3.bf16.msra.mxu1 %v935_v31  ;;  %859 = vmatprep.subr.bf16.mxu0 %v940_v38 }
  0x22   :  { %881 = vmatprep.subr.bf16.mxu1 %v941_v39 }
  0x23   :  { %600 = vmatmul.mubr.bf16.vlgmr.msra.gmra.mxu0 %v743_v34 }
  0x24   :  { %640 = vmatmul.mubr.bf16.vlgmr.msra.gmra.mxu1 %v745_v36  ;;  %860 = vmatpush3.bf16.msra.mxu0 %v942_v40 }
  0x25   :  { %882 = vmatpush3.bf16.msra.mxu1 %v943_v41  ;;  %861 = vmatprep.subr.bf16.mxu0 %v944_v42 }
  0x26   :  { %883 = vmatprep.subr.bf16.mxu1 %v945_v43 }
  0x28   :  { %862 = vmatpush3.bf16.msra.mxu0 %v946_v44 }
  0x29   :  { %884 = vmatpush3.bf16.msra.mxu1 %v947_v45  ;;  %863 = vmatprep.subr.bf16.mxu0 %v948_v46 }
  0x2a   :  { %885 = vmatprep.subr.bf16.mxu1 %v949_v47 }
  0x2c   :  { %864 = vmatpush3.bf16.msra.mxu0 %v950_v48 }
  0x2d   :  { %886 = vmatpush3.bf16.msra.mxu1 %v951_v49  ;;  %865 = vmatprep.subr.bf16.mxu0 %v952_v50 }
  0x2e   :  { %887 = vmatprep.subr.bf16.mxu1 %v953_v51 }
  0x30   :  { %866 = vmatpush3.bf16.msra.mxu0 %v954_v52 }
  0x31   :  { %888 = vmatpush3.bf16.msra.mxu1 %v955_v53  ;;  %867 = vmatprep.subr.bf16.mxu0 %v956_v54 }
  0x32   :  { %889 = vmatprep.subr.bf16.mxu1 %v957_v55 }
  0x34   :  { %868 = vmatpush3.bf16.msra.mxu0 %v958_v56 }
  0x35   :  { %890 = vmatpush3.bf16.msra.mxu1 %v959_v57  ;;  %869 = vmatprep.subr.bf16.mxu0 %v960_v58 }
  0x36   :  { %891 = vmatprep.subr.bf16.mxu1 %v961_v59 }
  0x38   :  { %870 = vmatpush3.bf16.msra.mxu0 %v962_v60 }
  0x39   :  { %892 = vmatpush3.bf16.msra.mxu1 %v963_v61  ;;  %871 = vmatprep.subr.bf16.mxu0 %v964_v62 }
  0x3a   :  { %893 = vmatprep.subr.bf16.mxu1 %v965_v63 }
  0x3c   :  { %872 = vmatpush3.bf16.msra.mxu0 %v966_v0 }
  0x3d   :  { %894 = vmatpush3.bf16.msra.mxu1 %v967_v1  ;;  %873 = vmatprep.subr.bf16.mxu0 %v968_v2 }
  0x3e   :  { %895 = vmatprep.subr.bf16.mxu1 %v969_v3 }
  0x3f   :  { %8 = vsyncpa [#allocation3], 0  ;;  %v749_v10 = vcombine.low %v19_v9, %v19_v9  ;;  %v750_v11 = vcombine.high %v19_v9, %v19_v9  ;;  %679 = vmatprep.mubr.bf16.mxu0 %v748_v8  ;;  %v742_v21 = vld [vmem:[%s1231_s2] ss:$0 sm:$0xff]  ;;  %s998_s13 = smov [#allocation2]  }
  0x40   :  { %874 = vmatpush3.bf16.msra.mxu0 %v970_v4  ;;  %s734_s14 = sshll.u32 %s998_s13, 4  ;;  %s735_s14 = int_to_ptr.vmem [resolvable:$true] %s734_s14 }
  0x41   :  { %896 = vmatpush3.bf16.msra.mxu1 %v971_v5  ;;  %719 = vmatprep.mubr.bf16.mxu1 %v750_v11  ;;  %s976_s2 = scalar_lea.vmem %s735_s14, 128  ;;  %p981_p1 = scmp.lt.s32.totalorder %s735_s14, %s735_s14 }
  0x42   :  { %p977_p0 = scmp.ne.s32.totalorder %s735_s14, %s976_s2  ;;  %p982_p2 = scmp.lt.s32.totalorder %s976_s2, %s976_s2 }
  0x43   :  { %680 = vmatmul.mubr.bf16.vlgmr.msra.gmra.mxu0 %v747_v7 }
  0x44   :  { %720 = vmatmul.mubr.bf16.vlgmr.msra.gmra.mxu1 %v749_v10  ;;  %p983_p3 = por %p982_p2, %p981_p1 }
  0x46   :  { %p984_p4 = pnand %p983_p3, %p977_p0 }
  0xe3   :  { %v831_v12 = vpop.f32.mrf.mxu0 }
  0xe4   :  { %v853_v13 = vpop.f32.mrf.mxu1 }
  0xe5   :  { %v832_v14 = vpop.f32.mrf.mxu0 }
  0xe6   :  { %v854_v15 = vpop.f32.mrf.mxu1  ;;  %v833_v20 = vadd.f32 %v832_v14, %v831_v12 }
  0xe7   :  { %v834_v16 = vpop.f32.mrf.mxu0  ;;  %v855_v23 = vadd.f32 %v854_v15, %v853_v13 }
  0xe8   :  { %v856_v17 = vpop.f32.mrf.mxu1  ;;  %v602_v22 = vadd.f32 %v833_v20, %v742_v21 }
  0xe9   :  { %v835_v18 = vpop.f32.mrf.mxu0 }
  0xea   :  { %v857_v19 = vpop.f32.mrf.mxu1  ;;  %v642_v28 = vadd.f32 %v855_v23, %v602_v22 }
 0x103   :  { %v875_v24 = vpop.f32.mrf.mxu0 }
 0x104   :  { %v897_v25 = vpop.f32.mrf.mxu1 }
 0x105   :  { %v876_v26 = vpop.f32.mrf.mxu0 }
 0x106   :  { %v898_v27 = vpop.f32.mrf.mxu1  ;;  %v877_v29 = vadd.f32 %v876_v26, %v875_v24 }
 0x107   :  { %v878_v30 = vpop.f32.mrf.mxu0  ;;  %v899_v33 = vadd.f32 %v898_v27, %v897_v25 }
 0x108   :  { %v900_v31 = vpop.f32.mrf.mxu1  ;;  %v682_v32 = vadd.f32 %v877_v29, %v642_v28 }
 0x109   :  { %v879_v34 = vpop.f32.mrf.mxu0 }
 0x10a   :  { %v901_v35 = vpop.f32.mrf.mxu1  ;;  %v722_v36 = vadd.f32 %v899_v33, %v682_v32 }
 0x10c   :  { %727 = vst [vmem:[#allocation2] sm:$0xff] %v722_v36 }
 0x10d   :  { %987 = shalt.err (!%p984_p4)
}
 0x10e   :  { %737 = dma.vmem_to_hbm [thread:$0]  %s735_s14, 128, %s1232_s3, [#allocation3]  }
 0x10f   :  { %996 = dma.done.wait [#allocation3], 128  }
 0x110   :  { %997 = vsyncadd [#allocation3], 4294967168 }
 0x111   :  { %741 = vsyncpa [#allocation3], 1 }

</bundles_post_ra>
